<compile_context>
chip_gen: v6e
topology: v6e:2x2x1
jax: 0.10.0
libtpu: 0.0.40
codegen_flags: <defaults>
</compile_context>

<pallas_src>
import jax
import jax.numpy as jnp
from jax.experimental import pallas as pl
from jax.experimental.pallas import tpu as pltpu

# ---------------- sizes ----------------
B = 8                # batch (== 8 so biases pre-broadcast to one sublane tile)
L = 16               # sequence length
ONEHOT = 4           # DNA alphabet size
F_HIST = 8           # histone feature dim
D_DNA = 16           # dna_module.fc.out_features
D_HIST = 16          # histone_module.fc1.out_features
D_CAT = D_DNA + D_HIST       # 32 — width of the concatenated representation
H_JOINT = 32         # config['joint_hidden_size']
K_IN = 16            # padded contraction dim of the fused layer-1 dot (8 feat + 4 pooled + 4 zero)
ACT_LANES = 128      # activation slab width (one f32 vreg row)
OUT_LANES = 128      # lane-dense output width (column 0 holds the result)
assert B == 8, "param-slab bias pre-broadcast assumes B == sublane count (8)"

# activation-slab lane offsets
FEAT_OFF = 0         # lanes 0..7   : histone features (f32)
SEQ_OFF = 16         # lanes 16..31 : sequence tokens as exact small f32
LEN_OFF = 32         # lane  32     : sequence length as exact small f32

# param-slab row offsets (all sublane-aligned)
W_IN_ROW = 0         # rows 0..15   : fused layer-1 weight (16, 32); rows 12..15 zero
W1_ROW = 16          # rows 16..47  : joint fc1 weight (32, 32)
B_CAT_ROW = 48       # rows 48..55  : [bd | bh] pre-broadcast to 8 sublanes
B1_ROW = 56          # rows 56..63  : b1 pre-broadcast
W2_ROW = 64          # rows 64..71  : fc2 weight row pre-broadcast
B2_ROW = 72          # rows 72..79  : fc2 bias pre-broadcast (lane 0)
PAR_ROWS = 80

_FLOPS = 2 * B * (K_IN * D_CAT + D_CAT * H_JOINT + H_JOINT) + 2 * B * L * ONEHOT
_BYTES = (B * ACT_LANES + PAR_ROWS * ACT_LANES + B * OUT_LANES) * 4


def joint_kernel(act_ref, par_ref, out_ref):
    # ---- unpack the activation slab (static lane slices of one resident tile) ----
    feat = act_ref[:, FEAT_OFF:FEAT_OFF + F_HIST]           # (B, 8)  f32
    seq = act_ref[:, SEQ_OFF:SEQ_OFF + L]                   # (B, 16) f32, exact ints
    lens = act_ref[:, LEN_OFF:LEN_OFF + 1]                  # (B, 1)  f32, exact ints

    # ---- dna_module front-end: masked one-hot mean-pool (VPU + lane reduces) ----
    pos = jax.lax.broadcasted_iota(jnp.int32, (B, L), 1).astype(jnp.float32)
    valid = pos < lens                                       # (B, L) bool
    inv_len = 1.0 / jnp.maximum(lens, 1.0)                   # exact divide (tolerance)
    counts = [
        jnp.sum(jnp.where(jnp.logical_and(valid, seq == float(c)), 1.0, 0.0),
                axis=1, keepdims=True)                       # (B, 1) per channel
        for c in range(ONEHOT)
    ]
    pooled = jnp.concatenate(counts, axis=1) * inv_len       # (B, 4), scaled once

    # ---- layer 1: ONE MXU dot over the fused [feat | pooled | 0] input ----
    # (wd / wh live in disjoint column ranges of w_in -> relu after the dot is
    #  identical to cat(relu(dna_fc), relu(hist_fc)).)
    x_in = jnp.concatenate(
        [feat, pooled, jnp.zeros((B, K_IN - F_HIST - ONEHOT), jnp.float32)],
        axis=1)                                              # (B, 16)
    z1 = jnp.maximum(
        jnp.dot(x_in, par_ref[W_IN_ROW:W_IN_ROW + K_IN, :D_CAT],
                preferred_element_type=jnp.float32)
        + par_ref[B_CAT_ROW:B_CAT_ROW + B, :D_CAT], 0.0)     # (B, 32)

    # ---- layer 2 (joint fc1): single MXU dot; bias already (B, H) — plain vadd ----
    h = jnp.maximum(
        jnp.dot(z1, par_ref[W1_ROW:W1_ROW + D_CAT, :H_JOINT],
                preferred_element_type=jnp.float32)
        + par_ref[B1_ROW:B1_ROW + B, :H_JOINT], 0.0)         # (B, 32)

    # dropout: identity in eval mode.

    # ---- layer 3 (joint fc2, out_features=1): VPU mul + lane reduce (no N=1 MXU) ----
    y = (jnp.sum(h * par_ref[W2_ROW:W2_ROW + B, :H_JOINT], axis=1, keepdims=True)
         + par_ref[B2_ROW:B2_ROW + B, :1])                   # (B, 1)

    # Lane-dense store (one full (8,128) vst, no masked partial store).
    out_ref[...] = jnp.broadcast_to(y, (B, OUT_LANES))


_vmem = pl.BlockSpec(memory_space=pltpu.MemorySpace.VMEM)

_joint_call = pl.pallas_call(
    joint_kernel,
    out_shape=jax.ShapeDtypeStruct((B, OUT_LANES), jnp.float32),
    in_specs=[_vmem, _vmem],
    out_specs=_vmem,
    cost_estimate=pl.CostEstimate(flops=_FLOPS, transcendentals=0,
                                  bytes_accessed=_BYTES),
)


def pack_activations(sequence, sequence_lengths, features):
    """Pack (seq, len, feat) into one lane-dense (B, 128) f32 slab.

    Values are small exact integers / f32, so a single f32 slab suffices (no
    bitcast needed).  Under jit this fuses into one tiny XLA fusion; callers
    that invoke the module repeatedly should emit this slab directly upstream.
    """
    act = jnp.zeros((B, ACT_LANES), jnp.float32)
    act = act.at[:, FEAT_OFF:FEAT_OFF + F_HIST].set(features.astype(jnp.float32))
    act = act.at[:, SEQ_OFF:SEQ_OFF + L].set(sequence.astype(jnp.float32))
    act = act.at[:, LEN_OFF].set(sequence_lengths.astype(jnp.float32))
    return act


@jax.jit
def joint_module_forward(sequence, sequence_lengths, features, par):
    act = pack_activations(sequence, sequence_lengths, features)
    out = _joint_call(act, par)
    return out[:, 0]                     # .squeeze(-1) in the spec -> (B,)


def make_params(key):
    ks = jax.random.split(key, 4)

    def lin(k, fan_in, fan_out):
        kw, kb = jax.random.split(k)
        w = jax.random.normal(kw, (fan_in, fan_out), jnp.float32) * 0.1
        b = jax.random.normal(kb, (1, fan_out), jnp.float32) * 0.1
        return w, b

    wd, bd = lin(ks[0], ONEHOT, D_DNA)       # dna_module.fc
    wh, bh = lin(ks[1], F_HIST, D_HIST)      # histone_module.fc1
    w1, b1 = lin(ks[2], D_CAT, H_JOINT)      # joint fc1 (rows: [dna | hist])
    w2, b2 = lin(ks[3], H_JOINT, 1)          # joint fc2

    logical = dict(wd=wd, bd=bd, wh=wh, bh=bh, w1=w1, b1=b1, w2=w2, b2=b2)

    # ---- single packed (80, 128) parameter slab, built once ----
    par = jnp.zeros((PAR_ROWS, ACT_LANES), jnp.float32)
    # fused layer-1 weight: feat rows -> histone cols, pooled rows -> dna cols
    par = par.at[W_IN_ROW:W_IN_ROW + F_HIST, D_DNA:D_CAT].set(wh)
    par = par.at[W_IN_ROW + F_HIST:W_IN_ROW + F_HIST + ONEHOT, 0:D_DNA].set(wd)
    # joint fc1 weight
    par = par.at[W1_ROW:W1_ROW + D_CAT, 0:H_JOINT].set(w1)
    # biases / fc2 row, pre-broadcast to 8 sublanes (plain vadd/vmul in-kernel)
    b_cat = jnp.concatenate([bd, bh], axis=1)                        # (1, 32)
    par = par.at[B_CAT_ROW:B_CAT_ROW + B, 0:D_CAT].set(jnp.broadcast_to(b_cat, (B, D_CAT)))
    par = par.at[B1_ROW:B1_ROW + B, 0:H_JOINT].set(jnp.broadcast_to(b1, (B, H_JOINT)))
    par = par.at[W2_ROW:W2_ROW + B, 0:H_JOINT].set(jnp.broadcast_to(w2[:, 0][None, :], (B, H_JOINT)))
    par = par.at[B2_ROW:B2_ROW + B, 0:1].set(jnp.broadcast_to(b2, (B, 1)))

    return logical, par


def reference_forward(sequence, sequence_lengths, features, p):
    onehot = jax.nn.one_hot(sequence, ONEHOT, dtype=jnp.float32)          # (B, L, 4)
    mask = (jnp.arange(L)[None, :] < sequence_lengths[:, None]).astype(jnp.float32)
    pooled = (onehot * mask[:, :, None]).sum(axis=1)
    pooled = pooled / jnp.maximum(sequence_lengths[:, None].astype(jnp.float32), 1.0)
    dna_out = jnp.maximum(pooled @ p["wd"] + p["bd"], 0.0)
    hist_out = jnp.maximum(features @ p["wh"] + p["bh"], 0.0)
    cat = jnp.concatenate([dna_out, hist_out], axis=1)
    h = jnp.maximum(cat @ p["w1"] + p["b1"], 0.0)
    return (h @ p["w2"] + p["b2"])[:, 0]


if __name__ == "__main__":
    key = jax.random.PRNGKey(0)
    k_seq, k_len, k_feat, k_par = jax.random.split(key, 4)

    sequence = jax.random.randint(k_seq, (B, L), 0, ONEHOT, dtype=jnp.int32)
    sequence_lengths = jax.random.randint(k_len, (B,), 4, L + 1, dtype=jnp.int32)
    features = jax.random.normal(k_feat, (B, F_HIST), jnp.float32)
    logical, par = make_params(k_par)

    out = joint_module_forward(sequence, sequence_lengths, features, par)
    out = jax.block_until_ready(out)

    ref = reference_forward(sequence, sequence_lengths, features, logical)
    assert out.shape == (B,)
    assert jnp.allclose(out, ref, atol=1e-5, rtol=1e-5), (out, ref)

    print("KERNEL_OK")
</pallas_src>

<mosaic_0001>
module attributes {stable_mosaic.version = 11 : i64} {
  func.func @joint_kernel(%arg0: memref<8x128xf32, #tpu.memory_space<vmem>>, %arg1: memref<80x128xf32, #tpu.memory_space<vmem>>, %arg2: memref<8x128xf32, #tpu.memory_space<vmem>>) attributes {dimension_semantics = [], scalar_prefetch = 0 : i64, scratch_operands = 0 : i64, tpu.core_type = #tpu.core_type<tc>} {
    %c0 = arith.constant 0 : index
    %c0_0 = arith.constant 0 : index
    %0 = vector.load %arg0[%c0, %c0_0] : memref<8x128xf32, #tpu.memory_space<vmem>>, vector<8x8xf32>
    %c0_1 = arith.constant 0 : index
    %c16 = arith.constant 16 : index
    %1 = vector.load %arg0[%c0_1, %c16] : memref<8x128xf32, #tpu.memory_space<vmem>>, vector<8x16xf32>
    %c0_2 = arith.constant 0 : index
    %c32 = arith.constant 32 : index
    %2 = vector.load %arg0[%c0_2, %c32] : memref<8x128xf32, #tpu.memory_space<vmem>>, vector<8x1xf32>
    %3 = tpu.iota {dimensions = array<i32: 1>} : vector<8x16xi32>
    %4 = arith.sitofp %3 : vector<8x16xi32> to vector<8x16xf32>
    %5 = vector.broadcast %2 : vector<8x1xf32> to vector<8x16xf32>
    %6 = arith.cmpf olt, %4, %5 : vector<8x16xf32>
    %cst = arith.constant 1.000000e+00 : f32
    %7 = vector.broadcast %cst : f32 to vector<8x1xf32>
    %8 = arith.maximumf %2, %7 : vector<8x1xf32>
    %cst_3 = arith.constant 1.000000e+00 : f32
    %9 = vector.broadcast %cst_3 : f32 to vector<8x1xf32>
    %10 = arith.divf %9, %8 : vector<8x1xf32>
    %cst_4 = arith.constant 0.000000e+00 : f32
    %11 = vector.broadcast %cst_4 : f32 to vector<8x16xf32>
    %12 = arith.cmpf oeq, %1, %11 : vector<8x16xf32>
    %13 = arith.andi %6, %12 : vector<8x16xi1>
    %cst_5 = arith.constant 1.000000e+00 : f32
    %cst_6 = arith.constant 0.000000e+00 : f32
    %14 = vector.broadcast %cst_5 : f32 to vector<8x16xf32>
    %15 = vector.broadcast %cst_6 : f32 to vector<8x16xf32>
    %16 = arith.select %13, %14, %15 : vector<8x16xi1>, vector<8x16xf32>
    %cst_7 = arith.constant dense<0.000000e+00> : vector<8xf32>
    %17 = vector.multi_reduction <add>, %16, %cst_7 [1] : vector<8x16xf32> to vector<8xf32>
    %18 = vector.shape_cast %17 : vector<8xf32> to vector<8x1xf32>
    %cst_8 = arith.constant 1.000000e+00 : f32
    %19 = vector.broadcast %cst_8 : f32 to vector<8x16xf32>
    %20 = arith.cmpf oeq, %1, %19 : vector<8x16xf32>
    %21 = arith.andi %6, %20 : vector<8x16xi1>
    %cst_9 = arith.constant 1.000000e+00 : f32
    %cst_10 = arith.constant 0.000000e+00 : f32
    %22 = vector.broadcast %cst_9 : f32 to vector<8x16xf32>
    %23 = vector.broadcast %cst_10 : f32 to vector<8x16xf32>
    %24 = arith.select %21, %22, %23 : vector<8x16xi1>, vector<8x16xf32>
    %cst_11 = arith.constant dense<0.000000e+00> : vector<8xf32>
    %25 = vector.multi_reduction <add>, %24, %cst_11 [1] : vector<8x16xf32> to vector<8xf32>
    %26 = vector.shape_cast %25 : vector<8xf32> to vector<8x1xf32>
    %cst_12 = arith.constant 2.000000e+00 : f32
    %27 = vector.broadcast %cst_12 : f32 to vector<8x16xf32>
    %28 = arith.cmpf oeq, %1, %27 : vector<8x16xf32>
    %29 = arith.andi %6, %28 : vector<8x16xi1>
    %cst_13 = arith.constant 1.000000e+00 : f32
    %cst_14 = arith.constant 0.000000e+00 : f32
    %30 = vector.broadcast %cst_13 : f32 to vector<8x16xf32>
    %31 = vector.broadcast %cst_14 : f32 to vector<8x16xf32>
    %32 = arith.select %29, %30, %31 : vector<8x16xi1>, vector<8x16xf32>
    %cst_15 = arith.constant dense<0.000000e+00> : vector<8xf32>
    %33 = vector.multi_reduction <add>, %32, %cst_15 [1] : vector<8x16xf32> to vector<8xf32>
    %34 = vector.shape_cast %33 : vector<8xf32> to vector<8x1xf32>
    %cst_16 = arith.constant 3.000000e+00 : f32
    %35 = vector.broadcast %cst_16 : f32 to vector<8x16xf32>
    %36 = arith.cmpf oeq, %1, %35 : vector<8x16xf32>
    %37 = arith.andi %6, %36 : vector<8x16xi1>
    %cst_17 = arith.constant 1.000000e+00 : f32
    %cst_18 = arith.constant 0.000000e+00 : f32
    %38 = vector.broadcast %cst_17 : f32 to vector<8x16xf32>
    %39 = vector.broadcast %cst_18 : f32 to vector<8x16xf32>
    %40 = arith.select %37, %38, %39 : vector<8x16xi1>, vector<8x16xf32>
    %cst_19 = arith.constant dense<0.000000e+00> : vector<8xf32>
    %41 = vector.multi_reduction <add>, %40, %cst_19 [1] : vector<8x16xf32> to vector<8xf32>
    %42 = vector.shape_cast %41 : vector<8xf32> to vector<8x1xf32>
    %43 = tpu.concatenate %18, %26, %34, %42 in 1 : vector<8x1xf32>, vector<8x1xf32>, vector<8x1xf32>, vector<8x1xf32> -> vector<8x4xf32>
    %44 = vector.broadcast %10 : vector<8x1xf32> to vector<8x4xf32>
    %45 = arith.mulf %43, %44 : vector<8x4xf32>
    %cst_20 = arith.constant 0.000000e+00 : f32
    %46 = vector.broadcast %cst_20 : f32 to vector<8x4xf32>
    %47 = tpu.concatenate %0, %45, %46 in 1 : vector<8x8xf32>, vector<8x4xf32>, vector<8x4xf32> -> vector<8x16xf32>
    %c0_21 = arith.constant 0 : index
    %c0_22 = arith.constant 0 : index
    %48 = vector.load %arg1[%c0_21, %c0_22] : memref<80x128xf32, #tpu.memory_space<vmem>>, vector<16x32xf32>
    %cst_23 = arith.constant dense<0.000000e+00> : vector<8x32xf32>
    %49 = tpu.matmul %47, %48, %cst_23 {dimension_numbers = #tpu.dot_dimension_numbers<[1], [0], [0], [1], [0, 0, 1, 1], [], []>} : vector<8x16xf32>, vector<16x32xf32>, vector<8x32xf32> -> vector<8x32xf32>
    %c48 = arith.constant 48 : index
    %c0_24 = arith.constant 0 : index
    %50 = vector.load %arg1[%c48, %c0_24] : memref<80x128xf32, #tpu.memory_space<vmem>>, vector<8x32xf32>
    %51 = arith.addf %49, %50 : vector<8x32xf32>
    %cst_25 = arith.constant 0.000000e+00 : f32
    %52 = vector.broadcast %cst_25 : f32 to vector<8x32xf32>
    %53 = arith.maximumf %51, %52 : vector<8x32xf32>
    %c16_26 = arith.constant 16 : index
    %c0_27 = arith.constant 0 : index
    %54 = vector.load %arg1[%c16_26, %c0_27] : memref<80x128xf32, #tpu.memory_space<vmem>>, vector<32x32xf32>
    %cst_28 = arith.constant dense<0.000000e+00> : vector<8x32xf32>
    %55 = tpu.matmul %53, %54, %cst_28 {dimension_numbers = #tpu.dot_dimension_numbers<[1], [0], [0], [1], [0, 0, 1, 1], [], []>} : vector<8x32xf32>, vector<32x32xf32>, vector<8x32xf32> -> vector<8x32xf32>
    %c56 = arith.constant 56 : index
    %c0_29 = arith.constant 0 : index
    %56 = vector.load %arg1[%c56, %c0_29] : memref<80x128xf32, #tpu.memory_space<vmem>>, vector<8x32xf32>
    %57 = arith.addf %55, %56 : vector<8x32xf32>
    %cst_30 = arith.constant 0.000000e+00 : f32
    %58 = vector.broadcast %cst_30 : f32 to vector<8x32xf32>
    %59 = arith.maximumf %57, %58 : vector<8x32xf32>
    %c64 = arith.constant 64 : index
    %c0_31 = arith.constant 0 : index
    %60 = vector.load %arg1[%c64, %c0_31] : memref<80x128xf32, #tpu.memory_space<vmem>>, vector<8x32xf32>
    %61 = arith.mulf %59, %60 : vector<8x32xf32>
    %cst_32 = arith.constant dense<0.000000e+00> : vector<8xf32>
    %62 = vector.multi_reduction <add>, %61, %cst_32 [1] : vector<8x32xf32> to vector<8xf32>
    %63 = vector.shape_cast %62 : vector<8xf32> to vector<8x1xf32>
    %c72 = arith.constant 72 : index
    %c0_33 = arith.constant 0 : index
    %64 = vector.load %arg1[%c72, %c0_33] : memref<80x128xf32, #tpu.memory_space<vmem>>, vector<8x1xf32>
    %65 = arith.addf %63, %64 : vector<8x1xf32>
    %66 = vector.shape_cast %65 : vector<8x1xf32> to vector<8x1xf32>
    %67 = vector.broadcast %66 : vector<8x1xf32> to vector<8x128xf32>
    %c0_34 = arith.constant 0 : index
    %c0_35 = arith.constant 0 : index
    %68 = vector.load %arg2[%c0_34, %c0_35] : memref<8x128xf32, #tpu.memory_space<vmem>>, vector<8x128xf32>
    tpu.vector_store %arg2[%c0_34, %c0_35], %67 {strides = array<i32>} : memref<8x128xf32, #tpu.memory_space<vmem>>, vector<8x128xf32>,
    return
  }
}

</mosaic_0001>

<bundles_post_ra>
// kernel: joint_module_forward.1
= control target key start
LH: loop header
LB: loop body
LE: loop exit
PB: predicated region body
PF: predicated region fallthrough
CT: control target
= control target key end

     0   :  { %v297_v0 = vmov 32   ;;  %v298_v2 = vmov 0.0   ;;  %v299_v3 = vmov 0   ;;  %s300_s11 = smov 112   ;;  %v12_v8 = vlaneseq  ;;  %s302_s17 = smov 8   ;;  %s392_s0 = inlined_call_operand.vmem [shape: f32[8,128], index: 0, kind: input, shape index: {}]   ;;  %s393_s1 = inlined_call_operand.vmem [shape: f32[80,128], index: 1, kind: input, shape index: {}]   ;;  %s394_s2 = inlined_call_operand.vmem [shape: f32[8,128], index: 2, kind: output, shape index: {}]  }
   0x1   :  { %293 = vset.pattern.permute.xlu0 %v297_v0  ;;  %v321_v1 = vld [vmem:[%s392_s0] sm:$0xff]  ;;  %269 = vmatprep.subr.mxu0 %v298_v2  ;;  %vm31_vm8 = vcmask 130048   ;;  %v86_v27 = vld [vmem:[%s393_s1 + $0x8] sm:$0xff]  ;;  %vm301_vm14 = vmmov 0   ;;  %vm65_vm15 = vcmask 7168   ;;  %v163_v43 = vld [vmem:[%s393_s1 + $0x18] sm:$0xff] }
   0x2   :  { %17 = vperm.xlu0 %293, %v321_v1   ;;  %vm35_vm0 = vcmp.eq.f32.partialorder %v321_v1, 1.0  ;;  %vm45_vm1 = vcmp.eq.f32.partialorder %v321_v1, 2.0  ;;  %vm24_vm2 = vcmp.eq.f32.partialorder %v321_v1, 0.0  ;;  %276 = vmatprep.subr.mxu1 %v298_v2  ;;  %vm55_vm3 = vcmp.eq.f32.partialorder %v321_v1, 3.0  ;;  %v85_v29 = vld [vmem:[%s393_s1] sm:$0xff]  ;;  %v165_v31 = vld [vmem:[%s393_s1 + $0x28] sm:$0xff] }
   0x3   :  { %v36_v4 = vsel %vm35_vm0, 1, %v299_v3  ;;  %v25_v5 = vsel %vm24_vm2, 1, %v299_v3  ;;  %v46_v6 = vsel %vm45_vm1, 1, %v299_v3  ;;  %v56_v7 = vsel %vm55_vm3, 1, %v299_v3  ;;  %270 = vmatpush3.msra.mxu0 %v86_v27  ;;  %273 = vmatprep.mubr.msk.f32.mxu0 %vm301_vm14, %v298_v2  ;;  %v164_v42 = vld [vmem:[%s393_s1 + $0x20] sm:$0xff]  ;;  %v162_v44 = vld [vmem:[%s393_s1 + $0x10] sm:$0xff] }
   0x4   :  { %37 = vrot.lane.b32.xlu1 %v36_v4, %s300_s11  ;;  %v13_v10 = vand.u32 127, %v12_v8  ;;  %v21_v24 = vmax.f32 %v321_v1, 1.0  ;;  %271 = vmatprep.subr.mxu0 %v298_v2  ;;  %vm67_vm0 = vcmask 15360   ;;  %vm69_vm1 = vcmask 23552   ;;  %v87_v45 = vld [vmem:[%s393_s1 + $0x30] sm:$0xff]  ;;  %v166_v50 = vld [vmem:[%s393_s1 + $0x38] sm:$0xff] }
   0x5   :  { %272 = vmatpush3.msra.mxu0 %v85_v29  ;;  %284 = vmatprep.mubr.msk.f32.mxu1 %vm301_vm14, %v298_v2  ;;  %vm81_vm2 = vcmask 64512   ;;  %vm83_vm3 = vcmask 97280   ;;  %v242_v54 = vld [vmem:[%s393_s1 + $0x40] sm:$0xff]  ;;  %v247_v58 = vld [vmem:[%s393_s1 + $0x48] sm:$0xff] }
   0x6   :  { %26 = vrot.lane.b32.xlu0 %v25_v5, %s300_s11  ;;  %v14_v11 = vcvt.s32.f32 %v13_v10  ;;  %295 = vrcp.f32 %v21_v24  ;;  %277 = vmatpush3.msra.mxu1 %v165_v31 }
   0x7   :  { %278 = vmatprep.subr.mxu1 %v298_v2 }
   0x8   :  { %47 = vrot.lane.b32.xlu1 %v46_v6, %s300_s11  ;;  %279 = vmatpush3.msra.mxu1 %v164_v42 }
   0x9   :  { %280 = vmatprep.subr.mxu1 %v298_v2 }
   0xa   :  { %57 = vrot.lane.b32.xlu0 %v56_v7, %s300_s11  ;;  %281 = vmatpush3.msra.mxu1 %v163_v43 }
   0xb   :  { %282 = vmatprep.subr.mxu1 %v298_v2 }
   0xc   :  { %283 = vmatpush3.msra.mxu1 %v162_v44 }
  0x13   :  { %v296_v26 = vpop.eup %295 }
  0x76   :  { %v38_v9 = vpop.permute.xlu1 %37 }
  0x77   :  { %vm39_vm5 = vcmp.ne.s32.totalorder %v38_v9, 0 }
  0x7a   :  { %v48_v12 = vpop.permute.xlu1 %47 }
  0x7b   :  { %vm49_vm4 = vcmp.ne.s32.totalorder %v48_v12, 0 }
  0x7d   :  { %v18_v13 = vpop.permute.xlu0 %17 }
  0x7e   :  { %vm330_vm6 = vcmp.lt.f32.partialorder %v14_v11, %v18_v13 }
  0x7f   :  { %vm50_vm7 = vmand %vm330_vm6, %vm49_vm4  ;;  %vm167_vm4 = vcmask 261120  }
  0x80   :  { %vm40_vm9 = vmand %vm330_vm6, %vm39_vm5  ;;  %v51_v18 = vsel %vm50_vm7, 1.0, %v298_v2 }
  0x81   :  { %v27_v15 = vpop.permute.xlu0 %26  ;;  %v41_v16 = vsel %vm40_vm9, 1.0, %v298_v2  ;;  %v52_v22 = vsel %vm31_vm8, %v51_v18, 0.0 }
  0x82   :  { %vm28_vm10 = vcmp.ne.s32.totalorder %v27_v15, 0  ;;  %v42_v17 = vsel %vm31_vm8, %v41_v16, 0.0 }
  0x83   :  { %vm29_vm11 = vmand %vm330_vm6, %vm28_vm10  ;;  %43 = vadd.xlane.f32.xlu0 %v42_v17 }
  0x84   :  { %v30_v19 = vsel %vm29_vm11, 1.0, %v298_v2 }
  0x85   :  { %v58_v20 = vpop.permute.xlu0 %57  ;;  %v32_v21 = vsel %vm31_vm8, %v30_v19, 0.0 }
  0x86   :  { %vm59_vm12 = vcmp.ne.s32.totalorder %v58_v20, 0  ;;  %33 = vadd.xlane.f32.xlu1 %v32_v21 }
  0x87   :  { %vm60_vm13 = vmand %vm330_vm6, %vm59_vm12  ;;  %53 = vadd.xlane.f32.xlu0 %v52_v22 }
  0x88   :  { %v61_v23 = vsel %vm60_vm13, 1.0, %v298_v2 }
  0x89   :  { %v62_v25 = vsel %vm31_vm8, %v61_v23, 0.0 }
  0x8a   :  { %63 = vadd.xlane.f32.xlu1 %v62_v25 }
  0x9d   :  { %73 = vperm.xlu0 %293, %v296_v26  }
  0xa1   :  { %294 = vset.pattern.permute.xlu0 %v299_v3 }
 0x10c   :  { %v44_v28 = vpop.xlane.xlu0 %43 }
 0x10f   :  { %v34_v30 = vpop.xlane.xlu1 %33 }
 0x110   :  { %v66_v32 = vsel %vm65_vm15, %v34_v30, %v44_v28  ;;  %v54_v33 = vpop.xlane.xlu0 %53 }
 0x111   :  { %v68_v35 = vsel %vm67_vm0, %v66_v32, %v54_v33 }
 0x113   :  { %v64_v34 = vpop.xlane.xlu1 %63 }
 0x114   :  { %v70_v36 = vsel %vm69_vm1, %v68_v35, %v64_v34 }
 0x118   :  { %v74_v37 = vpop.permute.xlu0 %73 }
 0x119   :  { %v76_v38 = vmul.f32 %v74_v37, %v70_v36 }
 0x11b   :  { %78 = vrot.lane.b32.xlu1 %v76_v38, %s302_s17 }
 0x18d   :  { %v79_v39 = vpop.permute.xlu1 %78 }
 0x18e   :  { %v82_v40 = vsel %vm81_vm2, %v321_v1, %v79_v39 }
 0x18f   :  { %v84_v41 = vsel %vm83_vm3, %v82_v40, 0.0 }
 0x190   :  { %274 = vmatmul.mubr.msk.f32.vlgmr.msra.gmra.mxu0 %vm31_vm8, %v84_v41 }
 0x250   :  { %v157_v46 = vpop.f32.mrf.mxu0 }
 0x251   :  { %v158_v47 = vadd.f32 %v157_v46, %v87_v45 }
 0x252   :  { %v275_v48 = vpop.f32.mrf.mxu0 }
 0x253   :  { %v161_v49 = vmax.f32 %v158_v47, 0.0 }
 0x255   :  { %285 = vmatmul.mubr.msk.f32.vlgmr.msra.gmra.mxu1 %vm167_vm4, %v161_v49 }
 0x315   :  { %v237_v51 = vpop.f32.mrf.mxu1 }
 0x316   :  { %v238_v52 = vadd.f32 %v237_v51, %v166_v50 }
 0x317   :  { %v286_v53 = vpop.f32.mrf.mxu1 }
 0x318   :  { %v241_v55 = vmax.f32 %v238_v52, 0.0 }
 0x31a   :  { %v243_v56 = vmul.f32 %v242_v54, %v241_v55 }
 0x31c   :  { %v244_v57 = vsel %vm167_vm4, %v243_v56, 0.0 }
 0x31d   :  { %245 = vadd.xlane.f32.xlu1 %v244_v57 }
 0x3a6   :  { %v246_v59 = vpop.xlane.xlu1 %245 }
 0x3a7   :  { %v248_v60 = vadd.f32 %v247_v58, %v246_v59 }
 0x3a9   :  { %251 = vperm.xlu0 %294, %v248_v60  }
 0x424   :  { %v252_v61 = vpop.permute.xlu0 %251 }
 0x425   :  { %254 = vst [vmem:[%s394_s2] sm:$0xff] %v252_v61 }

</bundles_post_ra>
